<compile_context>
chip_gen: v6e
topology: v6e:2x2x1
jax: 0.10.0
libtpu: 0.0.40
codegen_flags: <defaults>
</compile_context>

<pallas_src>
import functools

import jax
import jax.numpy as jnp
import numpy as np
from jax.experimental import pallas as pl
from jax.experimental.pallas import tpu as pltpu

EPS = 1e-5  # PyTorch InstanceNorm2d default


def _residual_block_kernel(x_ref, w1_ref, w2_ref, p_ref, o_ref,
                           pad_ref, stack_ref, *, C, H, W, TN, HALO):
    f32 = jnp.float32
    HW = H * W

    # lane -> column-within-row index; masks the dw = -1 / +1 taps at the
    # left/right image borders (after flattening, those lanes would otherwise
    # read the neighbouring row instead of the zero pad).
    lane = jax.lax.broadcasted_iota(jnp.int32, (1, 1, HW), 2)
    col = lane % W
    ok_left = col >= 1           # neighbour at dw = -1 is a real pixel
    ok_right = col <= (W - 2)    # neighbour at dw = +1 is a real pixel

    # Zero only the (lane-aligned) halos; the interior is fully overwritten
    # before every conv.  Done every step so "parallel" grid semantics stay
    # safe (each core owns its own scratch).
    zeros_halo = jnp.zeros((TN, C, HALO), f32)
    pad_ref[:, :, :HALO] = zeros_halo
    pad_ref[:, :, HALO + HW:] = zeros_halo

    def conv3x3(v, wf_ref):
        """3x3 / stride 1 / pad 1 conv of v: (TN, C, HW) -> (TN, C, HW).

        wf_ref: (C_out, 9*C_in) fused tap weights, flat index = k*C + c with
        k = kh*3 + kw.  One batched MXU matmul with contraction depth 9*C.
        """
        # Lane-aligned full-slab store (HALO % 128 == 0).
        pad_ref[:, :, HALO:HALO + HW] = v
        k = 0
        for dh in (-1, 0, 1):
            for dw in (-1, 0, 1):
                s = dh * W + dw
                # Row out-of-range taps read the zero halo; only the
                # within-row (dw) edge wrap needs an explicit mask.
                t = pad_ref[:, :, HALO + s:HALO + s + HW]
                if dw == -1:
                    t = jnp.where(ok_left, t, 0.0)
                elif dw == 1:
                    t = jnp.where(ok_right, t, 0.0)
                stack_ref[:, k * C:(k + 1) * C, :] = t
                k += 1
        wb = jnp.broadcast_to(wf_ref[...], (TN, C, 9 * C))   # 1 small bcast/conv
        return jnp.einsum('nok,nkp->nop', wb, stack_ref[...],
                          preferred_element_type=f32)

    def instance_norm(v, gamma, beta):
        """Per-(sample, channel) norm over H*W (biased variance) + affine."""
        inv_hw = 1.0 / float(HW)
        mean = jnp.sum(v, axis=-1, keepdims=True) * inv_hw           # (TN,C,1)
        msq = jnp.sum(v * v, axis=-1, keepdims=True) * inv_hw        # (TN,C,1)
        var = jnp.maximum(msq - mean * mean, 0.0)
        return (v - mean) * jax.lax.rsqrt(var + EPS) * gamma + beta

    g1 = p_ref[:, 0:1]
    b1 = p_ref[:, 1:2]
    g2 = p_ref[:, 2:3]
    b2 = p_ref[:, 3:4]

    # ---- stage 1: relu(norm1(conv1(x))) ----
    y = conv3x3(x_ref[...].astype(f32), w1_ref)
    y = jnp.maximum(instance_norm(y, g1, b1), 0.0)

    # ---- stage 2: norm2(conv2(y)) ----
    y = conv3x3(y, w2_ref)
    y = instance_norm(y, g2, b2)

    # ---- residual + relu (re-read x; don't keep it live across the convs) ----
    o_ref[...] = jnp.maximum(x_ref[...].astype(f32) + y, 0.0).astype(o_ref.dtype)


def _vmem_capacity_bytes():
    try:
        cap = getattr(pltpu.get_tpu_info(), "vmem_capacity_bytes", 0)
        if cap:
            return int(cap)
    except Exception:
        pass
    return 64 << 20   # conservative fallback (v7x per-core VMEM)


def _choose_tn(N, C, HW, HALO):
    """Pick images/step and an explicit VMEM limit for the compiler."""
    cap = _vmem_capacity_bytes()
    vmem_limit = min(cap * 3 // 4, 100 << 20)       # explicit scoped limit
    budget = vmem_limit // 2                        # headroom for compiler temps
    # Per-image working set: x/out blocks double-buffered (2+2), tap stack (9),
    # live temporaries (~5), plus the lane-padded halo scratch and weight bcast.
    per_image = (18 * C * HW + C * (HW + 2 * HALO) + 18 * C * C) * 4
    fixed = 2 * (9 * C * C) * 4 * 2 + (64 << 10)    # fused weights (dbl-buf) + misc
    tn = max(1, min(N, (budget - fixed) // max(per_image, 1)))
    if N >= 2:
        tn = min(tn, max(1, N // 2))   # keep grid length >= 2 (v7x has 2 TCs)
    while N % tn:
        tn -= 1
    return tn, int(vmem_limit)


def residual_block(x, w1, w2, g1, b1, g2, b2):
    """x: (N, C, H, W) f32.  w1/w2: (C, C, 3, 3) OIHW.  g*/b*: (C,)."""
    N, C, H, W = x.shape
    HW = H * W
    HALO = ((W + 1 + 127) // 128) * 128            # lane-aligned halo >= W+1
    TN, vmem_limit = _choose_tn(N, C, HW, HALO)

    # Pure layout work done by XLA outside the kernel.
    x_flat = x.reshape(N, C, HW)
    # Fused tap weights: Wf[o, (kh*3+kw)*C + c] = w[o, c, kh, kw].
    w1f = jnp.transpose(w1, (0, 2, 3, 1)).reshape(C, 9 * C)
    w2f = jnp.transpose(w2, (0, 2, 3, 1)).reshape(C, 9 * C)
    params = jnp.stack([g1, b1, g2, b2], axis=1)   # (C, 4) packed affine params

    kernel = functools.partial(_residual_block_kernel,
                               C=C, H=H, W=W, TN=TN, HALO=HALO)
    w_spec = pl.BlockSpec((C, 9 * C), lambda n: (0, 0))   # resident fused weights
    p_spec = pl.BlockSpec((C, 4), lambda n: (0, 0))       # packed gamma/beta

    out = pl.pallas_call(
        kernel,
        out_shape=jax.ShapeDtypeStruct((N, C, HW), x.dtype),
        grid=(N // TN,),
        in_specs=[
            pl.BlockSpec((TN, C, HW), lambda n: (n, 0, 0)),   # x (lane-dense)
            w_spec, w_spec,                                   # conv1 / conv2 taps
            p_spec,                                           # gamma1 beta1 gamma2 beta2
        ],
        out_specs=pl.BlockSpec((TN, C, HW), lambda n: (n, 0, 0)),
        scratch_shapes=[
            pltpu.VMEM((TN, C, HW + 2 * HALO), jnp.float32),  # lane-aligned halo pad
            pltpu.VMEM((TN, 9 * C, HW), jnp.float32),         # fused tap stack
        ],
        compiler_params=pltpu.CompilerParams(
            dimension_semantics=("parallel",),
            vmem_limit_bytes=vmem_limit),
    )(x_flat, w1f, w2f, params)
    return out.reshape(N, C, H, W)


def _reference(x, w1, w2, g1, b1, g2, b2):
    """Pure-JAX reference mirroring the PyTorch forward."""
    def conv(v, w):
        return jax.lax.conv_general_dilated(
            v, w, window_strides=(1, 1), padding=((1, 1), (1, 1)),
            dimension_numbers=("NCHW", "OIHW", "NCHW"))

    def inorm(v, g, b):
        mean = jnp.mean(v, axis=(2, 3), keepdims=True)
        var = jnp.mean((v - mean) ** 2, axis=(2, 3), keepdims=True)
        vn = (v - mean) * jax.lax.rsqrt(var + EPS)
        return vn * g[None, :, None, None] + b[None, :, None, None]

    y = jax.nn.relu(inorm(conv(x, w1), g1, b1))
    y = inorm(conv(y, w2), g2, b2)
    return jax.nn.relu(x + y)


if __name__ == "__main__":
    N, C, H, W = 2, 4, 16, 16

    key = jax.random.PRNGKey(0)
    kx, k1, k2, kg1, kb1, kg2, kb2 = jax.random.split(key, 7)

    x = jax.random.normal(kx, (N, C, H, W), dtype=jnp.float32)
    w1 = jax.random.normal(k1, (C, C, 3, 3), dtype=jnp.float32) * 0.2
    w2 = jax.random.normal(k2, (C, C, 3, 3), dtype=jnp.float32) * 0.2
    gamma1 = 1.0 + 0.1 * jax.random.normal(kg1, (C,), dtype=jnp.float32)
    beta1 = 0.1 * jax.random.normal(kb1, (C,), dtype=jnp.float32)
    gamma2 = 1.0 + 0.1 * jax.random.normal(kg2, (C,), dtype=jnp.float32)
    beta2 = 0.1 * jax.random.normal(kb2, (C,), dtype=jnp.float32)

    out = residual_block(x, w1, w2, gamma1, beta1, gamma2, beta2)
    out = jax.block_until_ready(out)

    ref = jax.block_until_ready(_reference(x, w1, w2, gamma1, beta1, gamma2, beta2))
    # Tolerance accommodates MXU f32 pass-precision / accumulation-order diffs.
    np.testing.assert_allclose(np.asarray(out), np.asarray(ref), rtol=2e-3, atol=2e-3)

    print("KERNEL_OK")
</pallas_src>

<mosaic_0001>
module attributes {stable_mosaic.version = 11 : i64} {
  func.func @_residual_block_kernel(%arg0: i32, %arg1: memref<1x4x256xf32, #tpu.memory_space<vmem>>, %arg2: memref<4x36xf32, #tpu.memory_space<vmem>>, %arg3: memref<4x36xf32, #tpu.memory_space<vmem>>, %arg4: memref<4x4xf32, #tpu.memory_space<vmem>>, %arg5: memref<1x4x256xf32, #tpu.memory_space<vmem>>, %arg6: memref<1x4x512xf32, #tpu.memory_space<vmem>>, %arg7: memref<1x36x256xf32, #tpu.memory_space<vmem>>) attributes {dimension_semantics = [#tpu.dimension_semantics<parallel>], iteration_bounds = array<i64: 2>, scalar_prefetch = 0 : i64, scratch_operands = 2 : i64, tpu.core_type = #tpu.core_type<tc>, window_params = [{transform_indices = @transform_0, window_bounds = array<i64: 1, 4, 256>}, {pipeline_mode = #tpu.pipeline_mode<synchronous>, transform_indices = @transform_1, window_bounds = array<i64: 4, 36>}, {pipeline_mode = #tpu.pipeline_mode<synchronous>, transform_indices = @transform_2, window_bounds = array<i64: 4, 36>}, {pipeline_mode = #tpu.pipeline_mode<synchronous>, transform_indices = @transform_3, window_bounds = array<i64: 4, 4>}, {transform_indices = @transform_4, window_bounds = array<i64: 1, 4, 256>}]} {
    %0 = tpu.iota {dimensions = array<i32: 2>} : vector<1x1x256xi32>
    %c16_i32 = arith.constant 16 : i32
    %c0_i32 = arith.constant 0 : i32
    %1 = arith.cmpi eq, %c16_i32, %c0_i32 : i32
    %c1_i32 = arith.constant 1 : i32
    %2 = arith.select %1, %c1_i32, %c16_i32 : i32
    %3 = vector.broadcast %2 : i32 to vector<1x1x256xi32>
    %4 = arith.remsi %0, %3 : vector<1x1x256xi32>
    %c0_i32_0 = arith.constant 0 : i32
    %5 = vector.broadcast %c0_i32_0 : i32 to vector<1x1x256xi32>
    %6 = arith.cmpi ne, %4, %5 : vector<1x1x256xi32>
    %c0_i32_1 = arith.constant 0 : i32
    %7 = vector.broadcast %c0_i32_1 : i32 to vector<1x1x256xi32>
    %8 = arith.cmpi slt, %4, %7 : vector<1x1x256xi32>
    %c0_i32_2 = arith.constant 0 : i32
    %9 = arith.cmpi slt, %2, %c0_i32_2 : i32
    %10 = vector.broadcast %9 : i1 to vector<1x1x256xi1>
    %11 = vector.broadcast %10 : vector<1x1x256xi1> to vector<1x1x256xi1>
    %12 = arith.xori %8, %11 : vector<1x1x256xi1>
    %13 = arith.andi %12, %6 : vector<1x1x256xi1>
    %14 = vector.broadcast %2 : i32 to vector<1x1x256xi32>
    %15 = arith.addi %4, %14 : vector<1x1x256xi32>
    %16 = arith.select %13, %15, %4 : vector<1x1x256xi1>, vector<1x1x256xi32>
    %c1_i32_3 = arith.constant 1 : i32
    %17 = vector.broadcast %c1_i32_3 : i32 to vector<1x1x256xi32>
    %18 = arith.cmpi sge, %16, %17 : vector<1x1x256xi32>
    %c14_i32 = arith.constant 14 : i32
    %19 = vector.broadcast %c14_i32 : i32 to vector<1x1x256xi32>
    %20 = arith.cmpi sle, %16, %19 : vector<1x1x256xi32>
    %cst = arith.constant 0.000000e+00 : f32
    %21 = vector.broadcast %cst : f32 to vector<1x4x128xf32>
    %c0 = arith.constant 0 : index
    %c0_4 = arith.constant 0 : index
    %c0_5 = arith.constant 0 : index
    %22 = vector.load %arg6[%c0, %c0_4, %c0_5] : memref<1x4x512xf32, #tpu.memory_space<vmem>>, vector<1x4x128xf32>
    tpu.vector_store %arg6[%c0, %c0_4, %c0_5], %21 {strides = array<i32>} : memref<1x4x512xf32, #tpu.memory_space<vmem>>, vector<1x4x128xf32>,
    %c0_6 = arith.constant 0 : index
    %c0_7 = arith.constant 0 : index
    %c384 = arith.constant 384 : index
    %23 = vector.load %arg6[%c0_6, %c0_7, %c384] : memref<1x4x512xf32, #tpu.memory_space<vmem>>, vector<1x4x128xf32>
    tpu.vector_store %arg6[%c0_6, %c0_7, %c384], %21 {strides = array<i32>} : memref<1x4x512xf32, #tpu.memory_space<vmem>>, vector<1x4x128xf32>,
    %c0_8 = arith.constant 0 : index
    %c0_9 = arith.constant 0 : index
    %24 = vector.load %arg4[%c0_8, %c0_9] : memref<4x4xf32, #tpu.memory_space<vmem>>, vector<4x1xf32>
    %c0_10 = arith.constant 0 : index
    %c1 = arith.constant 1 : index
    %25 = vector.load %arg4[%c0_10, %c1] : memref<4x4xf32, #tpu.memory_space<vmem>>, vector<4x1xf32>
    %c0_11 = arith.constant 0 : index
    %c2 = arith.constant 2 : index
    %26 = vector.load %arg4[%c0_11, %c2] : memref<4x4xf32, #tpu.memory_space<vmem>>, vector<4x1xf32>
    %c0_12 = arith.constant 0 : index
    %c3 = arith.constant 3 : index
    %27 = vector.load %arg4[%c0_12, %c3] : memref<4x4xf32, #tpu.memory_space<vmem>>, vector<4x1xf32>
    %c0_13 = arith.constant 0 : index
    %c0_14 = arith.constant 0 : index
    %c0_15 = arith.constant 0 : index
    %28 = vector.load %arg1[%c0_13, %c0_14, %c0_15] : memref<1x4x256xf32, #tpu.memory_space<vmem>>, vector<1x4x256xf32>
    %c0_16 = arith.constant 0 : index
    %c0_17 = arith.constant 0 : index
    %c128 = arith.constant 128 : index
    %29 = vector.load %arg6[%c0_16, %c0_17, %c128] : memref<1x4x512xf32, #tpu.memory_space<vmem>>, vector<1x4x256xf32>
    tpu.vector_store %arg6[%c0_16, %c0_17, %c128], %28 {strides = array<i32>} : memref<1x4x512xf32, #tpu.memory_space<vmem>>, vector<1x4x256xf32>,
    %c0_18 = arith.constant 0 : index
    %c0_19 = arith.constant 0 : index
    %c111 = arith.constant 111 : index
    %30 = vector.load %arg6[%c0_18, %c0_19, %c111] : memref<1x4x512xf32, #tpu.memory_space<vmem>>, vector<1x4x256xf32>
    %cst_20 = arith.constant 0.000000e+00 : f32
    %31 = vector.shape_cast %18 : vector<1x1x256xi1> to vector<1x1x256xi1>
    %32 = vector.broadcast %31 : vector<1x1x256xi1> to vector<1x4x256xi1>
    %33 = vector.broadcast %cst_20 : f32 to vector<1x4x256xf32>
    %34 = arith.select %32, %30, %33 : vector<1x4x256xi1>, vector<1x4x256xf32>
    %c0_21 = arith.constant 0 : index
    %c0_22 = arith.constant 0 : index
    %c0_23 = arith.constant 0 : index
    %35 = vector.load %arg7[%c0_21, %c0_22, %c0_23] : memref<1x36x256xf32, #tpu.memory_space<vmem>>, vector<1x4x256xf32>
    tpu.vector_store %arg7[%c0_21, %c0_22, %c0_23], %34 {strides = array<i32>} : memref<1x36x256xf32, #tpu.memory_space<vmem>>, vector<1x4x256xf32>,
    %c0_24 = arith.constant 0 : index
    %c0_25 = arith.constant 0 : index
    %c112 = arith.constant 112 : index
    %36 = vector.load %arg6[%c0_24, %c0_25, %c112] : memref<1x4x512xf32, #tpu.memory_space<vmem>>, vector<1x4x256xf32>
    %c0_26 = arith.constant 0 : index
    %c4 = arith.constant 4 : index
    %c0_27 = arith.constant 0 : index
    %37 = vector.load %arg7[%c0_26, %c4, %c0_27] : memref<1x36x256xf32, #tpu.memory_space<vmem>>, vector<1x4x256xf32>
    tpu.vector_store %arg7[%c0_26, %c4, %c0_27], %36 {strides = array<i32>} : memref<1x36x256xf32, #tpu.memory_space<vmem>>, vector<1x4x256xf32>,
    %c0_28 = arith.constant 0 : index
    %c0_29 = arith.constant 0 : index
    %c113 = arith.constant 113 : index
    %38 = vector.load %arg6[%c0_28, %c0_29, %c113] : memref<1x4x512xf32, #tpu.memory_space<vmem>>, vector<1x4x256xf32>
    %cst_30 = arith.constant 0.000000e+00 : f32
    %39 = vector.shape_cast %20 : vector<1x1x256xi1> to vector<1x1x256xi1>
    %40 = vector.broadcast %39 : vector<1x1x256xi1> to vector<1x4x256xi1>
    %41 = vector.broadcast %cst_30 : f32 to vector<1x4x256xf32>
    %42 = arith.select %40, %38, %41 : vector<1x4x256xi1>, vector<1x4x256xf32>
    %c0_31 = arith.constant 0 : index
    %c8 = arith.constant 8 : index
    %c0_32 = arith.constant 0 : index
    %43 = vector.load %arg7[%c0_31, %c8, %c0_32] : memref<1x36x256xf32, #tpu.memory_space<vmem>>, vector<1x4x256xf32>
    tpu.vector_store %arg7[%c0_31, %c8, %c0_32], %42 {strides = array<i32>} : memref<1x36x256xf32, #tpu.memory_space<vmem>>, vector<1x4x256xf32>,
    %c0_33 = arith.constant 0 : index
    %c0_34 = arith.constant 0 : index
    %c127 = arith.constant 127 : index
    %44 = vector.load %arg6[%c0_33, %c0_34, %c127] : memref<1x4x512xf32, #tpu.memory_space<vmem>>, vector<1x4x256xf32>
    %cst_35 = arith.constant 0.000000e+00 : f32
    %45 = vector.shape_cast %18 : vector<1x1x256xi1> to vector<1x1x256xi1>
    %46 = vector.broadcast %45 : vector<1x1x256xi1> to vector<1x4x256xi1>
    %47 = vector.broadcast %cst_35 : f32 to vector<1x4x256xf32>
    %48 = arith.select %46, %44, %47 : vector<1x4x256xi1>, vector<1x4x256xf32>
    %c0_36 = arith.constant 0 : index
    %c12 = arith.constant 12 : index
    %c0_37 = arith.constant 0 : index
    %49 = vector.load %arg7[%c0_36, %c12, %c0_37] : memref<1x36x256xf32, #tpu.memory_space<vmem>>, vector<1x4x256xf32>
    tpu.vector_store %arg7[%c0_36, %c12, %c0_37], %48 {strides = array<i32>} : memref<1x36x256xf32, #tpu.memory_space<vmem>>, vector<1x4x256xf32>,
    %c0_38 = arith.constant 0 : index
    %c0_39 = arith.constant 0 : index
    %c128_40 = arith.constant 128 : index
    %50 = vector.load %arg6[%c0_38, %c0_39, %c128_40] : memref<1x4x512xf32, #tpu.memory_space<vmem>>, vector<1x4x256xf32>
    %c0_41 = arith.constant 0 : index
    %c16 = arith.constant 16 : index
    %c0_42 = arith.constant 0 : index
    %51 = vector.load %arg7[%c0_41, %c16, %c0_42] : memref<1x36x256xf32, #tpu.memory_space<vmem>>, vector<1x4x256xf32>
    tpu.vector_store %arg7[%c0_41, %c16, %c0_42], %50 {strides = array<i32>} : memref<1x36x256xf32, #tpu.memory_space<vmem>>, vector<1x4x256xf32>,
    %c0_43 = arith.constant 0 : index
    %c0_44 = arith.constant 0 : index
    %c129 = arith.constant 129 : index
    %52 = vector.load %arg6[%c0_43, %c0_44, %c129] : memref<1x4x512xf32, #tpu.memory_space<vmem>>, vector<1x4x256xf32>
    %cst_45 = arith.constant 0.000000e+00 : f32
    %53 = vector.shape_cast %20 : vector<1x1x256xi1> to vector<1x1x256xi1>
    %54 = vector.broadcast %53 : vector<1x1x256xi1> to vector<1x4x256xi1>
    %55 = vector.broadcast %cst_45 : f32 to vector<1x4x256xf32>
    %56 = arith.select %54, %52, %55 : vector<1x4x256xi1>, vector<1x4x256xf32>
    %c0_46 = arith.constant 0 : index
    %c20 = arith.constant 20 : index
    %c0_47 = arith.constant 0 : index
    %57 = vector.load %arg7[%c0_46, %c20, %c0_47] : memref<1x36x256xf32, #tpu.memory_space<vmem>>, vector<1x4x256xf32>
    tpu.vector_store %arg7[%c0_46, %c20, %c0_47], %56 {strides = array<i32>} : memref<1x36x256xf32, #tpu.memory_space<vmem>>, vector<1x4x256xf32>,
    %c0_48 = arith.constant 0 : index
    %c0_49 = arith.constant 0 : index
    %c143 = arith.constant 143 : index
    %58 = vector.load %arg6[%c0_48, %c0_49, %c143] : memref<1x4x512xf32, #tpu.memory_space<vmem>>, vector<1x4x256xf32>
    %cst_50 = arith.constant 0.000000e+00 : f32
    %59 = vector.shape_cast %18 : vector<1x1x256xi1> to vector<1x1x256xi1>
    %60 = vector.broadcast %59 : vector<1x1x256xi1> to vector<1x4x256xi1>
    %61 = vector.broadcast %cst_50 : f32 to vector<1x4x256xf32>
    %62 = arith.select %60, %58, %61 : vector<1x4x256xi1>, vector<1x4x256xf32>
    %c0_51 = arith.constant 0 : index
    %c24 = arith.constant 24 : index
    %c0_52 = arith.constant 0 : index
    %63 = vector.load %arg7[%c0_51, %c24, %c0_52] : memref<1x36x256xf32, #tpu.memory_space<vmem>>, vector<1x4x256xf32>
    tpu.vector_store %arg7[%c0_51, %c24, %c0_52], %62 {strides = array<i32>} : memref<1x36x256xf32, #tpu.memory_space<vmem>>, vector<1x4x256xf32>,
    %c0_53 = arith.constant 0 : index
    %c0_54 = arith.constant 0 : index
    %c144 = arith.constant 144 : index
    %64 = vector.load %arg6[%c0_53, %c0_54, %c144] : memref<1x4x512xf32, #tpu.memory_space<vmem>>, vector<1x4x256xf32>
    %c0_55 = arith.constant 0 : index
    %c28 = arith.constant 28 : index
    %c0_56 = arith.constant 0 : index
    %65 = vector.load %arg7[%c0_55, %c28, %c0_56] : memref<1x36x256xf32, #tpu.memory_space<vmem>>, vector<1x4x256xf32>
    tpu.vector_store %arg7[%c0_55, %c28, %c0_56], %64 {strides = array<i32>} : memref<1x36x256xf32, #tpu.memory_space<vmem>>, vector<1x4x256xf32>,
    %c0_57 = arith.constant 0 : index
    %c0_58 = arith.constant 0 : index
    %c145 = arith.constant 145 : index
    %66 = vector.load %arg6[%c0_57, %c0_58, %c145] : memref<1x4x512xf32, #tpu.memory_space<vmem>>, vector<1x4x256xf32>
    %cst_59 = arith.constant 0.000000e+00 : f32
    %67 = vector.shape_cast %20 : vector<1x1x256xi1> to vector<1x1x256xi1>
    %68 = vector.broadcast %67 : vector<1x1x256xi1> to vector<1x4x256xi1>
    %69 = vector.broadcast %cst_59 : f32 to vector<1x4x256xf32>
    %70 = arith.select %68, %66, %69 : vector<1x4x256xi1>, vector<1x4x256xf32>
    %c0_60 = arith.constant 0 : index
    %c32 = arith.constant 32 : index
    %c0_61 = arith.constant 0 : index
    %71 = vector.load %arg7[%c0_60, %c32, %c0_61] : memref<1x36x256xf32, #tpu.memory_space<vmem>>, vector<1x4x256xf32>
    tpu.vector_store %arg7[%c0_60, %c32, %c0_61], %70 {strides = array<i32>} : memref<1x36x256xf32, #tpu.memory_space<vmem>>, vector<1x4x256xf32>,
    %c0_62 = arith.constant 0 : index
    %c0_63 = arith.constant 0 : index
    %72 = vector.load %arg2[%c0_62, %c0_63] : memref<4x36xf32, #tpu.memory_space<vmem>>, vector<4x36xf32>
    %73 = vector.shape_cast %72 : vector<4x36xf32> to vector<1x4x36xf32>
    %c0_64 = arith.constant 0 : index
    %c0_65 = arith.constant 0 : index
    %c0_66 = arith.constant 0 : index
    %74 = vector.load %arg7[%c0_64, %c0_65, %c0_66] : memref<1x36x256xf32, #tpu.memory_space<vmem>>, vector<1x36x256xf32>
    "tpu.trace_start"() <{level = 10 : i32, message = "nok,nkp->nop"}> : () -> ()
    %cst_67 = arith.constant dense<0.000000e+00> : vector<1x4x256xf32>
    %75 = tpu.matmul %73, %74, %cst_67 {dimension_numbers = #tpu.dot_dimension_numbers<[2], [1], [1], [2], [0, 0, 0, 1, 1, 2], [0], [0]>} : vector<1x4x36xf32>, vector<1x36x256xf32>, vector<1x4x256xf32> -> vector<1x4x256xf32>
    "tpu.trace_stop"() : () -> ()
    %cst_68 = arith.constant dense<0.000000e+00> : vector<1x4xf32>
    %76 = vector.multi_reduction <add>, %75, %cst_68 [2] : vector<1x4x256xf32> to vector<1x4xf32>
    %77 = vector.shape_cast %76 : vector<1x4xf32> to vector<1x4x1xf32>
    %cst_69 = arith.constant 3.906250e-03 : f32
    %78 = vector.broadcast %cst_69 : f32 to vector<1x4x1xf32>
    %79 = arith.mulf %77, %78 : vector<1x4x1xf32>
    %80 = arith.mulf %75, %75 : vector<1x4x256xf32>
    %cst_70 = arith.constant dense<0.000000e+00> : vector<1x4xf32>
    %81 = vector.multi_reduction <add>, %80, %cst_70 [2] : vector<1x4x256xf32> to vector<1x4xf32>
    %82 = vector.shape_cast %81 : vector<1x4xf32> to vector<1x4x1xf32>
    %cst_71 = arith.constant 3.906250e-03 : f32
    %83 = vector.broadcast %cst_71 : f32 to vector<1x4x1xf32>
    %84 = arith.mulf %82, %83 : vector<1x4x1xf32>
    %85 = arith.mulf %79, %79 : vector<1x4x1xf32>
    %86 = arith.subf %84, %85 : vector<1x4x1xf32>
    %cst_72 = arith.constant 0.000000e+00 : f32
    %87 = vector.broadcast %cst_72 : f32 to vector<1x4x1xf32>
    %88 = arith.maximumf %86, %87 : vector<1x4x1xf32>
    %89 = vector.broadcast %79 : vector<1x4x1xf32> to vector<1x4x256xf32>
    %90 = arith.subf %75, %89 : vector<1x4x256xf32>
    %cst_73 = arith.constant 9.99999974E-6 : f32
    %91 = vector.broadcast %cst_73 : f32 to vector<1x4x1xf32>
    %92 = arith.addf %88, %91 : vector<1x4x1xf32>
    %93 = math.rsqrt %92 : vector<1x4x1xf32>
    %94 = vector.broadcast %93 : vector<1x4x1xf32> to vector<1x4x256xf32>
    %95 = arith.mulf %90, %94 : vector<1x4x256xf32>
    %96 = vector.shape_cast %24 : vector<4x1xf32> to vector<1x4x1xf32>
    %97 = vector.broadcast %96 : vector<1x4x1xf32> to vector<1x4x256xf32>
    %98 = arith.mulf %95, %97 : vector<1x4x256xf32>
    %99 = vector.shape_cast %25 : vector<4x1xf32> to vector<1x4x1xf32>
    %100 = vector.broadcast %99 : vector<1x4x1xf32> to vector<1x4x256xf32>
    %101 = arith.addf %98, %100 : vector<1x4x256xf32>
    %cst_74 = arith.constant 0.000000e+00 : f32
    %102 = vector.broadcast %cst_74 : f32 to vector<1x4x256xf32>
    %103 = arith.maximumf %101, %102 : vector<1x4x256xf32>
    %c0_75 = arith.constant 0 : index
    %c0_76 = arith.constant 0 : index
    %c128_77 = arith.constant 128 : index
    %104 = vector.load %arg6[%c0_75, %c0_76, %c128_77] : memref<1x4x512xf32, #tpu.memory_space<vmem>>, vector<1x4x256xf32>
    tpu.vector_store %arg6[%c0_75, %c0_76, %c128_77], %103 {strides = array<i32>} : memref<1x4x512xf32, #tpu.memory_space<vmem>>, vector<1x4x256xf32>,
    %c0_78 = arith.constant 0 : index
    %c0_79 = arith.constant 0 : index
    %c111_80 = arith.constant 111 : index
    %105 = vector.load %arg6[%c0_78, %c0_79, %c111_80] : memref<1x4x512xf32, #tpu.memory_space<vmem>>, vector<1x4x256xf32>
    %cst_81 = arith.constant 0.000000e+00 : f32
    %106 = vector.shape_cast %18 : vector<1x1x256xi1> to vector<1x1x256xi1>
    %107 = vector.broadcast %106 : vector<1x1x256xi1> to vector<1x4x256xi1>
    %108 = vector.broadcast %cst_81 : f32 to vector<1x4x256xf32>
    %109 = arith.select %107, %105, %108 : vector<1x4x256xi1>, vector<1x4x256xf32>
    %c0_82 = arith.constant 0 : index
    %c0_83 = arith.constant 0 : index
    %c0_84 = arith.constant 0 : index
    %110 = vector.load %arg7[%c0_82, %c0_83, %c0_84] : memref<1x36x256xf32, #tpu.memory_space<vmem>>, vector<1x4x256xf32>
    tpu.vector_store %arg7[%c0_82, %c0_83, %c0_84], %109 {strides = array<i32>} : memref<1x36x256xf32, #tpu.memory_space<vmem>>, vector<1x4x256xf32>,
    %c0_85 = arith.constant 0 : index
    %c0_86 = arith.constant 0 : index
    %c112_87 = arith.constant 112 : index
    %111 = vector.load %arg6[%c0_85, %c0_86, %c112_87] : memref<1x4x512xf32, #tpu.memory_space<vmem>>, vector<1x4x256xf32>
    %c0_88 = arith.constant 0 : index
    %c4_89 = arith.constant 4 : index
    %c0_90 = arith.constant 0 : index
    %112 = vector.load %arg7[%c0_88, %c4_89, %c0_90] : memref<1x36x256xf32, #tpu.memory_space<vmem>>, vector<1x4x256xf32>
    tpu.vector_store %arg7[%c0_88, %c4_89, %c0_90], %111 {strides = array<i32>} : memref<1x36x256xf32, #tpu.memory_space<vmem>>, vector<1x4x256xf32>,
    %c0_91 = arith.constant 0 : index
    %c0_92 = arith.constant 0 : index
    %c113_93 = arith.constant 113 : index
    %113 = vector.load %arg6[%c0_91, %c0_92, %c113_93] : memref<1x4x512xf32, #tpu.memory_space<vmem>>, vector<1x4x256xf32>
    %cst_94 = arith.constant 0.000000e+00 : f32
    %114 = vector.shape_cast %20 : vector<1x1x256xi1> to vector<1x1x256xi1>
    %115 = vector.broadcast %114 : vector<1x1x256xi1> to vector<1x4x256xi1>
    %116 = vector.broadcast %cst_94 : f32 to vector<1x4x256xf32>
    %117 = arith.select %115, %113, %116 : vector<1x4x256xi1>, vector<1x4x256xf32>
    %c0_95 = arith.constant 0 : index
    %c8_96 = arith.constant 8 : index
    %c0_97 = arith.constant 0 : index
    %118 = vector.load %arg7[%c0_95, %c8_96, %c0_97] : memref<1x36x256xf32, #tpu.memory_space<vmem>>, vector<1x4x256xf32>
    tpu.vector_store %arg7[%c0_95, %c8_96, %c0_97], %117 {strides = array<i32>} : memref<1x36x256xf32, #tpu.memory_space<vmem>>, vector<1x4x256xf32>,
    %c0_98 = arith.constant 0 : index
    %c0_99 = arith.constant 0 : index
    %c127_100 = arith.constant 127 : index
    %119 = vector.load %arg6[%c0_98, %c0_99, %c127_100] : memref<1x4x512xf32, #tpu.memory_space<vmem>>, vector<1x4x256xf32>
    %cst_101 = arith.constant 0.000000e+00 : f32
    %120 = vector.shape_cast %18 : vector<1x1x256xi1> to vector<1x1x256xi1>
    %121 = vector.broadcast %120 : vector<1x1x256xi1> to vector<1x4x256xi1>
    %122 = vector.broadcast %cst_101 : f32 to vector<1x4x256xf32>
    %123 = arith.select %121, %119, %122 : vector<1x4x256xi1>, vector<1x4x256xf32>
    %c0_102 = arith.constant 0 : index
    %c12_103 = arith.constant 12 : index
    %c0_104 = arith.constant 0 : index
    %124 = vector.load %arg7[%c0_102, %c12_103, %c0_104] : memref<1x36x256xf32, #tpu.memory_space<vmem>>, vector<1x4x256xf32>
    tpu.vector_store %arg7[%c0_102, %c12_103, %c0_104], %123 {strides = array<i32>} : memref<1x36x256xf32, #tpu.memory_space<vmem>>, vector<1x4x256xf32>,
    %c0_105 = arith.constant 0 : index
    %c0_106 = arith.constant 0 : index
    %c128_107 = arith.constant 128 : index
    %125 = vector.load %arg6[%c0_105, %c0_106, %c128_107] : memref<1x4x512xf32, #tpu.memory_space<vmem>>, vector<1x4x256xf32>
    %c0_108 = arith.constant 0 : index
    %c16_109 = arith.constant 16 : index
    %c0_110 = arith.constant 0 : index
    %126 = vector.load %arg7[%c0_108, %c16_109, %c0_110] : memref<1x36x256xf32, #tpu.memory_space<vmem>>, vector<1x4x256xf32>
    tpu.vector_store %arg7[%c0_108, %c16_109, %c0_110], %125 {strides = array<i32>} : memref<1x36x256xf32, #tpu.memory_space<vmem>>, vector<1x4x256xf32>,
    %c0_111 = arith.constant 0 : index
    %c0_112 = arith.constant 0 : index
    %c129_113 = arith.constant 129 : index
    %127 = vector.load %arg6[%c0_111, %c0_112, %c129_113] : memref<1x4x512xf32, #tpu.memory_space<vmem>>, vector<1x4x256xf32>
    %cst_114 = arith.constant 0.000000e+00 : f32
    %128 = vector.shape_cast %20 : vector<1x1x256xi1> to vector<1x1x256xi1>
    %129 = vector.broadcast %128 : vector<1x1x256xi1> to vector<1x4x256xi1>
    %130 = vector.broadcast %cst_114 : f32 to vector<1x4x256xf32>
    %131 = arith.select %129, %127, %130 : vector<1x4x256xi1>, vector<1x4x256xf32>
    %c0_115 = arith.constant 0 : index
    %c20_116 = arith.constant 20 : index
    %c0_117 = arith.constant 0 : index
    %132 = vector.load %arg7[%c0_115, %c20_116, %c0_117] : memref<1x36x256xf32, #tpu.memory_space<vmem>>, vector<1x4x256xf32>
    tpu.vector_store %arg7[%c0_115, %c20_116, %c0_117], %131 {strides = array<i32>} : memref<1x36x256xf32, #tpu.memory_space<vmem>>, vector<1x4x256xf32>,
    %c0_118 = arith.constant 0 : index
    %c0_119 = arith.constant 0 : index
    %c143_120 = arith.constant 143 : index
    %133 = vector.load %arg6[%c0_118, %c0_119, %c143_120] : memref<1x4x512xf32, #tpu.memory_space<vmem>>, vector<1x4x256xf32>
    %cst_121 = arith.constant 0.000000e+00 : f32
    %134 = vector.shape_cast %18 : vector<1x1x256xi1> to vector<1x1x256xi1>
    %135 = vector.broadcast %134 : vector<1x1x256xi1> to vector<1x4x256xi1>
    %136 = vector.broadcast %cst_121 : f32 to vector<1x4x256xf32>
    %137 = arith.select %135, %133, %136 : vector<1x4x256xi1>, vector<1x4x256xf32>
    %c0_122 = arith.constant 0 : index
    %c24_123 = arith.constant 24 : index
    %c0_124 = arith.constant 0 : index
    %138 = vector.load %arg7[%c0_122, %c24_123, %c0_124] : memref<1x36x256xf32, #tpu.memory_space<vmem>>, vector<1x4x256xf32>
    tpu.vector_store %arg7[%c0_122, %c24_123, %c0_124], %137 {strides = array<i32>} : memref<1x36x256xf32, #tpu.memory_space<vmem>>, vector<1x4x256xf32>,
    %c0_125 = arith.constant 0 : index
    %c0_126 = arith.constant 0 : index
    %c144_127 = arith.constant 144 : index
    %139 = vector.load %arg6[%c0_125, %c0_126, %c144_127] : memref<1x4x512xf32, #tpu.memory_space<vmem>>, vector<1x4x256xf32>
    %c0_128 = arith.constant 0 : index
    %c28_129 = arith.constant 28 : index
    %c0_130 = arith.constant 0 : index
    %140 = vector.load %arg7[%c0_128, %c28_129, %c0_130] : memref<1x36x256xf32, #tpu.memory_space<vmem>>, vector<1x4x256xf32>
    tpu.vector_store %arg7[%c0_128, %c28_129, %c0_130], %139 {strides = array<i32>} : memref<1x36x256xf32, #tpu.memory_space<vmem>>, vector<1x4x256xf32>,
    %c0_131 = arith.constant 0 : index
    %c0_132 = arith.constant 0 : index
    %c145_133 = arith.constant 145 : index
    %141 = vector.load %arg6[%c0_131, %c0_132, %c145_133] : memref<1x4x512xf32, #tpu.memory_space<vmem>>, vector<1x4x256xf32>
    %cst_134 = arith.constant 0.000000e+00 : f32
    %142 = vector.shape_cast %20 : vector<1x1x256xi1> to vector<1x1x256xi1>
    %143 = vector.broadcast %142 : vector<1x1x256xi1> to vector<1x4x256xi1>
    %144 = vector.broadcast %cst_134 : f32 to vector<1x4x256xf32>
    %145 = arith.select %143, %141, %144 : vector<1x4x256xi1>, vector<1x4x256xf32>
    %c0_135 = arith.constant 0 : index
    %c32_136 = arith.constant 32 : index
    %c0_137 = arith.constant 0 : index
    %146 = vector.load %arg7[%c0_135, %c32_136, %c0_137] : memref<1x36x256xf32, #tpu.memory_space<vmem>>, vector<1x4x256xf32>
    tpu.vector_store %arg7[%c0_135, %c32_136, %c0_137], %145 {strides = array<i32>} : memref<1x36x256xf32, #tpu.memory_space<vmem>>, vector<1x4x256xf32>,
    %c0_138 = arith.constant 0 : index
    %c0_139 = arith.constant 0 : index
    %147 = vector.load %arg3[%c0_138, %c0_139] : memref<4x36xf32, #tpu.memory_space<vmem>>, vector<4x36xf32>
    %148 = vector.shape_cast %147 : vector<4x36xf32> to vector<1x4x36xf32>
    %c0_140 = arith.constant 0 : index
    %c0_141 = arith.constant 0 : index
    %c0_142 = arith.constant 0 : index
    %149 = vector.load %arg7[%c0_140, %c0_141, %c0_142] : memref<1x36x256xf32, #tpu.memory_space<vmem>>, vector<1x36x256xf32>
    "tpu.trace_start"() <{level = 10 : i32, message = "nok,nkp->nop"}> : () -> ()
    %cst_143 = arith.constant dense<0.000000e+00> : vector<1x4x256xf32>
    %150 = tpu.matmul %148, %149, %cst_143 {dimension_numbers = #tpu.dot_dimension_numbers<[2], [1], [1], [2], [0, 0, 0, 1, 1, 2], [0], [0]>} : vector<1x4x36xf32>, vector<1x36x256xf32>, vector<1x4x256xf32> -> vector<1x4x256xf32>
    "tpu.trace_stop"() : () -> ()
    %cst_144 = arith.constant dense<0.000000e+00> : vector<1x4xf32>
    %151 = vector.multi_reduction <add>, %150, %cst_144 [2] : vector<1x4x256xf32> to vector<1x4xf32>
    %152 = vector.shape_cast %151 : vector<1x4xf32> to vector<1x4x1xf32>
    %cst_145 = arith.constant 3.906250e-03 : f32
    %153 = vector.broadcast %cst_145 : f32 to vector<1x4x1xf32>
    %154 = arith.mulf %152, %153 : vector<1x4x1xf32>
    %155 = arith.mulf %150, %150 : vector<1x4x256xf32>
    %cst_146 = arith.constant dense<0.000000e+00> : vector<1x4xf32>
    %156 = vector.multi_reduction <add>, %155, %cst_146 [2] : vector<1x4x256xf32> to vector<1x4xf32>
    %157 = vector.shape_cast %156 : vector<1x4xf32> to vector<1x4x1xf32>
    %cst_147 = arith.constant 3.906250e-03 : f32
    %158 = vector.broadcast %cst_147 : f32 to vector<1x4x1xf32>
    %159 = arith.mulf %157, %158 : vector<1x4x1xf32>
    %160 = arith.mulf %154, %154 : vector<1x4x1xf32>
    %161 = arith.subf %159, %160 : vector<1x4x1xf32>
    %cst_148 = arith.constant 0.000000e+00 : f32
    %162 = vector.broadcast %cst_148 : f32 to vector<1x4x1xf32>
    %163 = arith.maximumf %161, %162 : vector<1x4x1xf32>
    %164 = vector.broadcast %154 : vector<1x4x1xf32> to vector<1x4x256xf32>
    %165 = arith.subf %150, %164 : vector<1x4x256xf32>
    %cst_149 = arith.constant 9.99999974E-6 : f32
    %166 = vector.broadcast %cst_149 : f32 to vector<1x4x1xf32>
    %167 = arith.addf %163, %166 : vector<1x4x1xf32>
    %168 = math.rsqrt %167 : vector<1x4x1xf32>
    %169 = vector.broadcast %168 : vector<1x4x1xf32> to vector<1x4x256xf32>
    %170 = arith.mulf %165, %169 : vector<1x4x256xf32>
    %171 = vector.shape_cast %26 : vector<4x1xf32> to vector<1x4x1xf32>
    %172 = vector.broadcast %171 : vector<1x4x1xf32> to vector<1x4x256xf32>
    %173 = arith.mulf %170, %172 : vector<1x4x256xf32>
    %174 = vector.shape_cast %27 : vector<4x1xf32> to vector<1x4x1xf32>
    %175 = vector.broadcast %174 : vector<1x4x1xf32> to vector<1x4x256xf32>
    %176 = arith.addf %173, %175 : vector<1x4x256xf32>
    %c0_150 = arith.constant 0 : index
    %c0_151 = arith.constant 0 : index
    %c0_152 = arith.constant 0 : index
    %177 = vector.load %arg1[%c0_150, %c0_151, %c0_152] : memref<1x4x256xf32, #tpu.memory_space<vmem>>, vector<1x4x256xf32>
    %178 = arith.addf %177, %176 : vector<1x4x256xf32>
    %cst_153 = arith.constant 0.000000e+00 : f32
    %179 = vector.broadcast %cst_153 : f32 to vector<1x4x256xf32>
    %180 = arith.maximumf %178, %179 : vector<1x4x256xf32>
    %c0_154 = arith.constant 0 : index
    %c0_155 = arith.constant 0 : index
    %c0_156 = arith.constant 0 : index
    %181 = vector.load %arg5[%c0_154, %c0_155, %c0_156] : memref<1x4x256xf32, #tpu.memory_space<vmem>>, vector<1x4x256xf32>
    tpu.vector_store %arg5[%c0_154, %c0_155, %c0_156], %180 {strides = array<i32>} : memref<1x4x256xf32, #tpu.memory_space<vmem>>, vector<1x4x256xf32>,
    return
  }
  func.func @transform_0(%arg0: i32) -> (i32, i32, i32) {
    %c0_i32 = arith.constant 0 : i32
    %c0_i32_0 = arith.constant 0 : i32
    %c0_i32_1 = arith.constant 0 : i32
    return %arg0, %c0_i32, %c0_i32_0 : i32, i32, i32
  }
  func.func @transform_1(%arg0: i32) -> (i32, i32) {
    %c0_i32 = arith.constant 0 : i32
    %c0_i32_0 = arith.constant 0 : i32
    %c0_i32_1 = arith.constant 0 : i32
    return %c0_i32, %c0_i32_0 : i32, i32
  }
  func.func @transform_2(%arg0: i32) -> (i32, i32) {
    %c0_i32 = arith.constant 0 : i32
    %c0_i32_0 = arith.constant 0 : i32
    %c0_i32_1 = arith.constant 0 : i32
    return %c0_i32, %c0_i32_0 : i32, i32
  }
  func.func @transform_3(%arg0: i32) -> (i32, i32) {
    %c0_i32 = arith.constant 0 : i32
    %c0_i32_0 = arith.constant 0 : i32
    %c0_i32_1 = arith.constant 0 : i32
    return %c0_i32, %c0_i32_0 : i32, i32
  }
  func.func @transform_4(%arg0: i32) -> (i32, i32, i32) {
    %c0_i32 = arith.constant 0 : i32
    %c0_i32_0 = arith.constant 0 : i32
    %c0_i32_1 = arith.constant 0 : i32
    return %arg0, %c0_i32, %c0_i32_0 : i32, i32, i32
  }
}

</mosaic_0001>

<bundles_post_ra>
// kernel: tpu_custom_call.1
= control target key start
LH: loop header
LB: loop body
LE: loop exit
PB: predicated region body
PF: predicated region fallthrough
CT: control target
= control target key end

     0   :  { %9 = vsyncpa [#allocation5], 0  ;;  %s1669_s0 = inlined_call_operand.hbm [shape: f32[2,4,256], index: 0, kind: input, shape index: {}]   ;;  %s1670_s1 = inlined_call_operand.hbm [shape: f32[4,36], index: 1, kind: input, shape index: {}]   ;;  %s1671_s2 = inlined_call_operand.hbm [shape: f32[4,36], index: 2, kind: input, shape index: {}]   ;;  %s1672_s3 = inlined_call_operand.vmem [shape: f32[4,4], index: 3, kind: input, shape index: {}]   ;;  %s1673_s4 = inlined_call_operand.hbm [shape: f32[2,4,256], index: 4, kind: output, shape index: {}]  }
   0x1   :  { %11 = vsyncpa [#allocation5 + $0x1], 0 }
   0x2   :  { %12 = vsyncpa [#allocation8], 0 }
   0x3   :  { %13 = vsyncpa [#allocation6], 0 }
   0x4   :  { %15 = vsyncpa [#allocation6 + $0x1], 0  ;;  %s1320_s15 = smov 0   ;;  %s1322_s16 = smov 0  }
   0x5   :  { %s1324_s17 = smov 0   ;;  %s1326_s18 = smov 0  }
   0x6 LB: > { %s1341_s19 = sadd.s32 4294967295, %s1276_s18   ;;  %s1001_s20 = sadd.s32 4294967294, %s1276_s18   ;;  %s1276_s18 = sphi %s1326_s18, %s1703_s18   ;;  %s1272_s17 = sphi %s1324_s17, %s1702_s17   ;;  %s1268_s16 = sphi %s1322_s16, %s1701_s16   ;;  %s1264_s15 = sphi %s1320_s15, %s1700_s15  }
   0x7   : > { %p41_p0 = scmp.ne.s32.totalorder %s1268_s16, %s1264_s15  ;;  %p1674_p1 = scmp.eq.s32.totalorder %s1341_s19, 0 }
   0x8   : > { %p134_p3 = scmp.eq.s32.totalorder %s1001_s20, 1  ;;  %p1002_p5 = scmp.ge.s32.totalorder %s1276_s18, 1 }
   0x9   : > { %p1350_p4 = por %p1674_p1, %p41_p0  ;;  %p141_p7 = scmp.lt.s32.totalorder %s1276_s18, 3 }
   0xa   : > { %p1355_p6 = por %p134_p3, %p41_p0  ;;  %s1278_s24 = smov [#allocation7]  }
   0xb   : > { %s1678_s21 = scalar_select %p1350_p4, 1, 0 }
   0xc   : > { %s1679_s22 = scalar_select %p1355_p6, 1, 0 }
   0xd   : > { %p1360_p8 = pnand %p1002_p5, %p141_p7  ;;  %s154_s25 = sshll.u32 %s1278_s24, 4  ;;  %s155_s25 = int_to_ptr.vmem [resolvable:$true] %s154_s25 }
   0xe   : > { %s1279_s26 = smov [#allocation9]   ;;  %s1374_s29 = sadd.s32 1, %s1276_s18  }
   0xf   : > { %s1680_s23 = scalar_select %p1360_p8, 1, 0 }
  0x10   : > { %p1039_p10 = pneg %p1360_p8  ;;  %s165_s27 = sshll.u32 %s1279_s26, 4  ;;  %s166_s27 = int_to_ptr.vmem [resolvable:$true] %s165_s27 }
  0x11   : > { %s25_s30 = ssub.s32 %s1276_s18, %s1374_s29  ;;  %s1139_s5 = scalar_lea.vmem %s155_s25, 64 }
  0x12   : > { %p1369_p11 = pnand %p1039_p10, %p1674_p1  ;;  %p1140_p13 = scmp.ne.s32.totalorder %s155_s25, %s1139_s5 }
  0x13   : > { %p1147_p5 = scmp.lt.s32.totalorder %s155_s25, %s155_s25  ;;  %p1148_p7 = scmp.lt.s32.totalorder %s1139_s5, %s1139_s5 }
  0x14   : > { %p1130_p12 = pneg %p1369_p11 }
  0x15   : > { %p1149_p10 = por %p1148_p7, %p1147_p5 }
  0x16   : > { %p1142_p0 = pnand %p1140_p13, %p1130_p12 }
  0x18   : > { %p1143_p3 = pneg %p1142_p0 }
  0x1a   : > { %p1150_p9 = pnand %p1149_p10, %p1143_p3 }
  0x1c   : > { %1153 = shalt.err (!%p1150_p9)
}
  0x1d   : > { %1042 = dma.hbm_to_vmem [thread:$0]  (!%p1369_p11), %s1670_s1, 64, %s155_s25, [#allocation8]  }
  0x1e   : > { %s1165_s8 = scalar_lea.vmem %s166_s27, 64  ;;  %p1173_p13 = scmp.lt.s32.totalorder %s166_s27, %s166_s27 }
  0x1f   : > { %p1166_p1 = scmp.ne.s32.totalorder %s166_s27, %s1165_s8  ;;  %p1174_p0 = scmp.lt.s32.totalorder %s1165_s8, %s1165_s8 }
  0x21   : > { %p1168_p2 = pnand %p1166_p1, %p1130_p12  ;;  %p1175_p4 = por %p1174_p0, %p1173_p13 }
  0x23   : > { %p1169_p6 = pneg %p1168_p2 }
  0x25   : > { %p1176_p8 = pnand %p1175_p4, %p1169_p6 }
  0x27   : > { %1179 = shalt.err (!%p1176_p8)
}
  0x28   : > { %1045 = dma.hbm_to_vmem [thread:$0]  (!%p1369_p11), %s1671_s2, 64, %s166_s27, [#allocation8]  }
  0x29   : > { %p26_p1 = scmp.eq.s32.totalorder %s25_s30, 0  ;;  %s28_s11 = sadd.s32 1, %s1272_s17 }
  0x2a   : > { %p35_p2 = scmp.ne.s32.totalorder %s1272_s17, %s1268_s16  ;;  %p36_p4 = scmp.eq.s32.totalorder %s1276_s18, 0 }
  0x2b   : > { %s1401_s12 = scalar_select %p26_p1, %s1272_s17, %s28_s11  }
  0x2c   : > { %p37_p6 = por %p36_p4, %p35_p2  ;;  %p1682_p8 = scmp.eq.s32.totalorder %s1341_s19, 1 }
  0x2d   : > { %p1056_p12 = scmp.lt.s32.totalorder %s1276_s18, 2  ;;  %s179_s14 = sand.u32 1, %s1272_s17  }
  0x2e   : > { %p1405_p9 = por %p1682_p8, %p35_p2  ;;  %s1006_s20 = sshll.u32 %s179_s14, 3 }
  0x2f   : > { %s1025_s24 = sshll.u32 %s1276_s18, 7  ;;  %s183_s28 = scalar_lea.vmem [#allocation4], %s1006_s20 }
  0x30   : > { %s1683_s13 = scalar_select %p1405_p9, 1, 0 }
  0x31   : > { %s1415_s27 = scalar_lea.hbm %s1669_s0, %s1025_s24  ;;  %s191_s30 = sshll.u32 %s183_s28, 4  ;;  %s192_s30 = int_to_ptr.vmem [resolvable:$true] %s191_s30 }
  0x32   : > { %p1417_p11 = pnand %p1056_p12, %p37_p6  ;;  %s180_s6 = scalar_lea.sflag [#allocation5], %s179_s14 }
  0x33   : > { %s1180_s7 = scalar_lea.hbm %s1415_s27, 128  ;;  %s1185_s10 = scalar_lea.hbm %s1669_s0, 256 }
  0x34   : > { %p1181_p3 = scmp.ne.s32.totalorder %s1415_s27, %s1180_s7  ;;  %p1182_p5 = pneg %p1417_p11 }
  0x35   : > { %p1186_p13 = scmp.lt.s32.totalorder %s1415_s27, %s1669_s0  ;;  %p1187_p0 = scmp.lt.s32.totalorder %s1185_s10, %s1180_s7 }
  0x36   : > { %p1183_p7 = pnand %p1182_p5, %p1181_p3 }
  0x37   : > { %p1188_p1 = por %p1187_p0, %p1186_p13 }
  0x38   : > { %p1184_p10 = pneg %p1183_p7 }
  0x3a   : > { %p1189_p2 = pnand %p1188_p1, %p1184_p10 }
  0x3c   : > { %1192 = shalt.err (!%p1189_p2)
}
  0x3d   : > { %s1193_s24 = scalar_lea.vmem %s192_s30, 128  ;;  %s1280_s14 = smov [#allocation4]  }
  0x3e   : > { %p1194_p4 = scmp.ne.s32.totalorder %s192_s30, %s1193_s24  ;;  %s1198_s25 = sshll.u32 %s1280_s14, 4  ;;  %s1199_s25 = int_to_ptr.vmem [resolvable:$false] %s1198_s25 }
  0x3f   : > { %s1200_s26 = scalar_lea.vmem %s1199_s25, 256  ;;  %p1201_p12 = scmp.lt.s32.totalorder %s192_s30, %s1199_s25 }
  0x40   : > { %p1196_p6 = pnand %p1194_p4, %p1182_p5  ;;  %p1202_p3 = scmp.lt.s32.totalorder %s1200_s26, %s1193_s24 }
  0x42   : > { %p1197_p8 = pneg %p1196_p6  ;;  %p1203_p7 = por %p1202_p3, %p1201_p12 }
  0x44   : > { %p1204_p9 = pnand %p1203_p7, %p1197_p8 }
  0x46   : > { %1207 = shalt.err (!%p1204_p9)
}
  0x47   : > { %1049 = dma.hbm_to_vmem [thread:$0]  (!%p1417_p11), %s1415_s27, 128, %s192_s30, %s180_s6  }
  0x48   : > { %p1685_p10 = scmp.ne.s32.totalorder %s1680_s23, 0 }
  0x49   : > { %s1438_s28 = sand.u32 (!%p1685_p10), 1, %s1268_s16   ;;  %p1686_p5 = scmp.ne.s32.totalorder (!%p1685_p10), %s1678_s21, 0 }
  0x4a   : > { %200 = sbr.rel (%p1685_p10) target bundleno = 1190 (0x4a6), region = 36  ;;  %s1010_s7 = sshll.u32 (!%p1685_p10), %s1438_s28, 3 }
  0x4b   : > { %s203_s8 = scalar_lea.sflag (!%p1685_p10), [#allocation5], %s1438_s28  ;;  %s206_s9 = scalar_lea.vmem (!%p1685_p10), [#allocation4], %s1010_s7 }
  0x4f   : > { %1251 = dma.done.wait (%p1686_p5), %s203_s8, 128  }
  0x50   : > { %1253 = vsyncadd (%p1686_p5), %s203_s8, 4294967168  ;;  %p1687_p9 = scmp.eq.s32.totalorder %s1341_s19, 0 }
  0x52   : > { %1255 = dma.done.wait (%p1687_p9), [#allocation8], 128   ;;  %p1688_p11 = pmov %p1687_p9 }
  0x53   : > { %v1281_v0 = vmov 0.0   ;;  %v1452_v1 = vld [vmem:[%s206_s9] sm:$0xff]  ;;  %s1282_s23 = smov 111   ;;  %s1283_s21 = smov 127   ;;  %v239_v15 = vlaneseq  ;;  %vm385_vm0 = vcmask 1039360   ;;  %vm450_vm3 = vcmask 908288  }
  0x54   : > { %1257 = vsyncadd (%p1688_p11), [#allocation8], 4294967168  ;;  %271 = vst [vmem:[#allocation2 + $0xc] sm:$0xf] %v1281_v0  ;;  %545 = vmatprep.mubr.f32.mxu0 %v1281_v0  ;;  %847 = vmatprep.mubr.f32.mxu1 %v1281_v0  ;;  %v443_v3 = vcombine.high %v1452_v1, %v1452_v1  ;;  %s1284_s27 = smov 112   ;;  %s1285_s30 = smov 113   ;;  %v424_v9 = vcombine.low %v1452_v1, %v1452_v1 }
  0x55   : > { %270 = vst [vmem:[#allocation2] sm:$0xf] %v1281_v0  ;;  %274 = vst [vmem:[#allocation2 + $0x4] sm:$0xff] %v1452_v1  ;;  %444 = vrot.lane.b32.xlu1 %v1452_v1, %s1282_s23  ;;  %s1286_s5 = smov 1   ;;  %s1287_s6 = smov 15   ;;  %v240_v16 = vand.u32 127, %v239_v15 }
  0x56   : > { %372 = vst [vmem:[#allocation3 + $0x48] sm:$0xf] %v1452_v1  ;;  %373 = vst [vmem:[#allocation3 + $0x28] sm:$0xf] %v443_v3  ;;  %s1288_s10 = smov 17   ;;  %s1289_s11 = smov 16  }
  0x57   : > { %v241_v19 = vadd.s32 128, %v240_v16  ;;  %v246_v22 = vand.u32 15, %v240_v16  ;;  %vm411_vm4 = vcmask 924672   ;;  %vm432_vm7 = vcmask 916480   ;;  %s1026_s14 = sshll.u32 %s1341_s19, 7  ;;  %s238_s25 = scalar_lea.vmem [#allocation10], %s1010_s7 }
  0x58   : > { %vm353_vm8 = vcmask 7168   ;;  %vm474_vm9 = vcmask 1043456   ;;  %vm333_vm10 = vcmask 121856   ;;  %vm290_vm11 = vcmask 138240   ;;  %s912_s26 = sshll.u32 %s238_s25, 4  ;;  %p1697_p0 = scmp.ne.s32.totalorder %s1683_s13, 0  ;;  %s913_s26 = int_to_ptr.vmem [resolvable:$true] %s912_s26 }
  0x59   : > { %379 = vrot.lane.b32.xlu1 %v1452_v1, %s1283_s21  ;;  %v253_v23 = vand.u32 15, %v241_v19  ;;  %vm1488_vm1 = vcmp.le.s32.totalorder %v246_v22, 14  ;;  %vm1502_vm5 = vcmp.ge.s32.totalorder %v246_v22, 1  ;;  %vm311_vm12 = vcmask 130048  }
  0x5a   : > { %vm470_vm13 = vcmask 293888  }
  0x5b   : > { %v440_v2 = vld [vmem:[#allocation2 + $0xc] sm:$0xf]  ;;  %vm1492_vm2 = vcmp.le.s32.totalorder %v253_v23, 14  ;;  %vm1506_vm6 = vcmp.ge.s32.totalorder %v253_v23, 1 }
  0x5c   : > { %448 = vrot.lane.b32.xlu0 %v440_v2, %s1282_s23  ;;  %v375_v4 = vld [vmem:[#allocation2 + $0xc] sm:$0xf]  ;;  %v342_v6 = vld [vmem:[#allocation2] sm:$0xff]  ;;  %v343_v10 = vld [vmem:[#allocation2 + $0x8] sm:$0xf] }
  0x5d   : > { %v401_v5 = vld [vmem:[#allocation2 + $0xc] sm:$0xf]  ;;  %428 = vrot.lane.b32.xlu1 %v1452_v1, %s1284_s27  ;;  %v346_v7 = vcombine.high %v342_v6, %v342_v6  ;;  %v319_v11 = vld [vmem:[#allocation2 + $0x8] sm:$0xf]  ;;  %v303_v13 = vcombine.low %v342_v6, %v342_v6 }
  0x5e   : > { %v1113_v8 = vld [vmem:[#allocation2 + $0xc] ss:$0 sps:$4 sm:$0xff]   ;;  %v276_v12 = vld [vmem:[#allocation2 + $0x8] sm:$0xf] }
  0x5f   : > { %v1116_v14 = vld [vmem:[#allocation2 + $0x8] ss:$0 sps:$4 sm:$0xff]  }
  0x60   : > { %383 = vrot.lane.b32.xlu0 %v375_v4, %s1283_s21 }
  0x61   : > { %381 = vrot.lane.b32.xlu1 %v443_v3, %s1283_s21 }
  0x64   : > { %409 = vrot.lane.b32.xlu0 %v401_v5, %s1285_s30 }
  0x65   : > { %407 = vrot.lane.b32.xlu1 %v443_v3, %s1285_s30 }
  0x68   : > { %405 = vrot.lane.b32.xlu0 %v1452_v1, %s1285_s30 }
  0x69   : > { %349 = vrot.lane.b32.xlu1 %v346_v7, %s1286_s5 }
  0x6c   : > { %446 = vrot.lane.b32.xlu0 %v443_v3, %s1282_s23 }
  0x6d   : > { %426 = vrot.lane.b32.xlu1 %v424_v9, %s1284_s27 }
  0x70   : > { %430 = vrot.lane.b32.xlu0 %v1113_v8, %s1284_s27 }
  0x71   : > { %329 = vrot.lane.b32.xlu1 %v346_v7, %s1287_s6 }
  0x74   : > { %351 = vrot.lane.b32.xlu0 %v343_v10, %s1286_s5 }
  0x75   : > { %327 = vrot.lane.b32.xlu1 %v342_v6, %s1287_s6 }
  0x78   : > { %347 = vrot.lane.b32.xlu0 %v342_v6, %s1286_s5 }
  0x79   : > { %288 = vrot.lane.b32.xlu1 %v276_v12, %s1288_s10 }
  0x7c   : > { %331 = vrot.lane.b32.xlu0 %v319_v11, %s1287_s6 }
  0x7d   : > { %307 = vrot.lane.b32.xlu1 %v342_v6, %s1289_s11 }
  0x80   : > { %286 = vrot.lane.b32.xlu0 %v346_v7, %s1288_s10 }
  0x81   : > { %305 = vrot.lane.b32.xlu1 %v303_v13, %s1289_s11 }
  0x84   : > { %284 = vrot.lane.b32.xlu0 %v342_v6, %s1288_s10 }
  0x88   : > { %309 = vrot.lane.b32.xlu0 %v1116_v14, %s1289_s11 }
  0xc7   : > { %v445_v17 = vpop.permute.xlu1 %444 }
  0xcb   : > { %v380_v20 = vpop.permute.xlu1 %379 }
  0xce   : > { %v449_v18 = vpop.permute.xlu0 %448 }
  0xcf   : > { %v429_v24 = vpop.permute.xlu1 %428 }
  0xd2   : > { %v384_v21 = vpop.permute.xlu0 %383 }
  0xd3   : > { %v382_v28 = vpop.permute.xlu1 %381 }
  0xd4   : > { %v386_v30 = vsel %vm385_vm0, %v380_v20, %v382_v28  ;;  %v387_v31 = vsel %vm385_vm0, %v382_v28, %v384_v21  ;;  %v459_v28 = vld [vmem:[#allocation7] sm:$0xf] }
  0xd5   : > { %v390_v32 = vsel %vm1488_vm1, %v386_v30, 0.0  ;;  %v391_v33 = vsel %vm1492_vm2, %v387_v31, 0.0  ;;  %v1290_v30 = vmov 0   ;;  %v1291_v31 = vmov 1  }
  0xd6   : > { %v410_v25 = vpop.permute.xlu0 %409  ;;  %v394_v34 = vrot.slane %v390_v32, 4  ;;  %v395_v35 = vrot.slane %v391_v33, 4  ;;  %1107 = vset.pattern.permute.xlu0 %v1290_v30  ;;  %1108 = vset.pattern.permute.xlu1 %v1291_v31 }
  0xd7   : > { %v408_v38 = vpop.permute.xlu1 %407 }
  0xd8   : > { %398 = vst [vmem:[#allocation3 + $0x48] sm:$0xf0] %v394_v34  ;;  %399 = vst [vmem:[#allocation3 + $0x28] sm:$0xf0] %v395_v35  ;;  %v413_v41 = vsel %vm411_vm4, %v408_v38, %v410_v25 }
  0xd9   : > { %v417_v45 = vsel %vm1506_vm6, %v413_v41, 0.0 }
  0xda   : > { %v406_v29 = vpop.permute.xlu0 %405  ;;  %419 = vst [vmem:[#allocation3 + $0x20] sm:$0xf] %v417_v45  ;;  %v745_v45 = vld [vmem:[#allocation2 + $0xc] sm:$0xf] }
  0xdb   : > { %v412_v40 = vsel %vm411_vm4, %v406_v29, %v408_v38  ;;  %v350_v48 = vpop.permute.xlu1 %349 }
  0xdc   : > { %v416_v44 = vsel %vm1502_vm5, %v412_v40, 0.0 }
  0xdd   : > { %418 = vst [vmem:[#allocation3 + $0x8] sm:$0xf] %v416_v44  ;;  %v1554_v44 = vld [vmem:[%s1672_s3] sm:$0xf] }
  0xde   : > { %v447_v39 = vpop.permute.xlu0 %446 }
  0xdf   : > { %v451_v42 = vsel %vm450_vm3, %v445_v17, %v447_v39  ;;  %v452_v43 = vsel %vm450_vm3, %v447_v39, %v449_v18  ;;  %v427_v51 = vpop.permute.xlu1 %426  ;;  %v465_v8 = vld [vmem:[#allocation3 + $0x28] sm:$0xff] }
  0xe0   : > { %v455_v46 = vsel %vm1488_vm1, %v451_v42, 0.0  ;;  %v456_v47 = vsel %vm1492_vm2, %v452_v43, 0.0  ;;  %v433_v53 = vsel %vm432_vm7, %v427_v51, %v429_v24  ;;  %v464_v10 = vld [vmem:[#allocation3 + $0x48] sm:$0xff] }
  0xe1   : > { %457 = vst [vmem:[#allocation3 + $0x40] sm:$0xf] %v455_v46  ;;  %458 = vst [vmem:[#allocation3 + $0x38] sm:$0xf] %v456_v47  ;;  %v708_v46 = vld [vmem:[#allocation2 + $0xc] sm:$0xf] }
  0xe2   : > { %v431_v49 = vpop.permute.xlu0 %430  ;;  %437 = vst [vmem:[#allocation3 + $0x8] sm:$0xf0] %v433_v53  ;;  %v1118_v47 = vld [vmem:[#allocation2 + $0xc] ss:$0 sps:$4 sm:$0xff]  }
  0xe3   : > { %v434_v50 = vsel %vm432_vm7, %v429_v24, %v431_v49  ;;  %v330_v59 = vpop.permute.xlu1 %329 }
  0xe4   : > { %438 = vst [vmem:[#allocation3 + $0x20] sm:$0xf0] %v434_v50 }
  0xe6   : > { %v352_v52 = vpop.permute.xlu0 %351 }
  0xe7   : > { %v355_v54 = vsel %vm353_vm8, %v350_v48, %v352_v52  ;;  %v328_v2 = vpop.permute.xlu1 %327 }
  0xe8   : > { %v469_v55 = vld [vmem:[#allocation3 + $0x38] sm:$0xf]  ;;  %v359_v56 = vsel %vm1506_vm6, %v355_v54, 0.0  ;;  %v468_v57 = vld [vmem:[#allocation3 + $0x40] sm:$0xf]  ;;  %v334_v4 = vsel %vm333_vm10, %v328_v2, %v330_v59 }
  0xe9   : > { %1014 = vmatprep.subr.msk.mxu0 %vm474_vm9, %v469_v55  ;;  %v363_v58 = vrot.slane %v359_v56, 4  ;;  %v466_v5 = vld [vmem:[#allocation3 + $0x8] sm:$0xff]  ;;  %v338_v7 = vsel %vm1488_vm1, %v334_v4, 0.0 }
  0xea   : > { %1015 = vmatpush1.msk.msra.mxu0 %vm474_vm9, %v468_v57  ;;  %v348_v60 = vpop.permute.xlu0 %347  ;;  %340 = vst [vmem:[#allocation3 + $0x18] sm:$0xf] %v338_v7 }
  0xeb   : > { %367 = vst [vmem:[#allocation3 + $0x10] sm:$0xf0] %v363_v58  ;;  %v354_v61 = vsel %vm353_vm8, %v348_v60, %v350_v48  ;;  %v467_v62 = vld [vmem:[#allocation3 + $0x20] sm:$0xff]  ;;  %v289_v11 = vpop.permute.xlu1 %288  ;;  %v683_v48 = vld [vmem:[#allocation2 + $0xc] sm:$0xf] }
  0xec   : > { %v358_v63 = vsel %vm1502_vm5, %v354_v61, 0.0  ;;  %505 = vmatprep.subr.mxu0 %v467_v62 }
  0xed   : > { %v362_v0 = vrot.slane %v358_v63, 4  ;;  %506 = vmatpush1.msra.mxu0 %v466_v5 }
  0xee   : > { %v332_v3 = vpop.permute.xlu0 %331  ;;  %507 = vmatprep.subr.mxu0 %v465_v8 }
  0xef   : > { %366 = vst [vmem:[#allocation3 + $0x18] sm:$0xf0] %v362_v0  ;;  %v335_v6 = vsel %vm333_vm10, %v330_v59, %v332_v3  ;;  %508 = vmatpush1.msra.mxu0 %v464_v10  ;;  %v308_v15 = vpop.permute.xlu1 %307 }
  0xf0   : > { %v339_v9 = vsel %vm1492_vm2, %v335_v6, 0.0 }
  0xf1   : > { %341 = vst [vmem:[#allocation3 + $0x10] sm:$0xf] %v339_v9 }
  0xf2   : > { %v287_v12 = vpop.permute.xlu0 %286 }
  0xf3   : > { %v292_v13 = vsel %vm290_vm11, %v287_v12, %v289_v11  ;;  %v306_v21 = vpop.permute.xlu1 %305 }
  0xf4   : > { %v296_v14 = vsel %vm1506_vm6, %v292_v13, 0.0  ;;  %v312_v23 = vsel %vm311_vm12, %v306_v21, %v308_v15 }
  0xf5   : > { %298 = vst [vmem:[#allocation3] sm:$0xf] %v296_v14  ;;  %316 = vst [vmem:[#allocation3 + $0x30] sm:$0xf0] %v312_v23 }
  0xf6   : > { %v285_v16 = vpop.permute.xlu0 %284  ;;  %v462_v20 = vld [vmem:[#allocation3 + $0x18] sm:$0xff] }
  0xf7   : > { %v291_v17 = vsel %vm290_vm11, %v285_v16, %v287_v12 }
  0xf8   : > { %v295_v18 = vsel %vm1502_vm5, %v291_v17, 0.0  ;;  %v463_v19 = vld [vmem:[#allocation3 + $0x10] sm:$0xff] }
  0xf9   : > { %297 = vst [vmem:[#allocation3 + $0x30] sm:$0xf] %v295_v18  ;;  %509 = vmatprep.subr.mxu0 %v463_v19 }
  0xfa   : > { %v310_v22 = vpop.permute.xlu0 %309  ;;  %510 = vmatpush1.msra.mxu0 %v462_v20 }
  0xfb   : > { %v313_v24 = vsel %vm311_vm12, %v308_v15, %v310_v22 }
  0xfc   : > { %317 = vst [vmem:[#allocation3] sm:$0xf0] %v313_v24 }
 0x100   : > { %v460_v29 = vld [vmem:[#allocation3 + $0x30] sm:$0xff] }
 0x103   : > { %v461_v25 = vld [vmem:[#allocation3] sm:$0xff] }
 0x104   : > { %511 = vmatprep.subr.mxu0 %v461_v25 }
 0x105   : > { %512 = vmatpush1.msra.mxu0 %v460_v29 }
 0x106   : > { %1016 = vmatmul.mubr.msk.f32.vlgmr.msra.gmra.mxu0 %vm470_vm13, %v459_v28 }
 0x1c6   : > { %v547_v32 = vpop.f32.mrf.mxu0 }
 0x1c7   : > { %v558_v33 = vmul.f32 %v547_v32, %v547_v32  ;;  %v552_v39 = vsel %vm474_vm9, %v547_v32, 0.0 }
 0x1c8   : > { %v549_v34 = vpop.f32.mrf.mxu0 }
 0x1c9   : > { %v553_v35 = vsel %vm474_vm9, %v549_v34, 0.0  ;;  %v559_v38 = vmul.f32 %v549_v34, %v549_v34  ;;  %v560_v41 = vsel %vm474_vm9, %v558_v33, 0.0 }
 0x1ca   : > { %v554_v40 = vadd.f32 %v553_v35, %v552_v39 }
 0x1cb   : > { %v561_v42 = vsel %vm474_vm9, %v559_v38, 0.0 }
 0x1cc   : > { %555 = vadd.xlane.f32.xlu0 %v554_v40  ;;  %v562_v43 = vadd.f32 %v561_v42, %v560_v41 }
 0x1ce   : > { %563 = vadd.xlane.f32.xlu1 %v562_v43 }
 0x1df   : > { %583 = vperm.xlu1 %1108, %v1554_v44  }
 0x1e2   : > { %577 = vperm.xlu0 %1107, %v1554_v44  }
 0x1e3   : > { %753 = vrot.lane.b32.xlu1 %v745_v45, %s1282_s23 }
 0x1e6   : > { %716 = vrot.lane.b32.xlu0 %v708_v46, %s1285_s30 }
 0x1e7   : > { %691 = vrot.lane.b32.xlu1 %v683_v48, %s1283_s21 }
 0x1ea   : > { %736 = vrot.lane.b32.xlu0 %v1118_v47, %s1284_s27 }
 0x255   : > { %v556_v49 = vpop.xlane.xlu0 %555 }
 0x256   : > { %v557_v50 = vmul.f32 0.00390625, %v556_v49 }
 0x257   : > { %v564_v51 = vpop.xlane.xlu1 %563 }
 0x258   : > { %v565_v52 = vmul.f32 0.00390625, %v564_v51  ;;  %v566_v53 = vmul.f32 %v557_v50, %v557_v50  ;;  %v569_v57 = vsub.f32 %v547_v32, %v557_v50  ;;  %v570_v58 = vsub.f32 %v549_v34, %v557_v50 }
 0x25a   : > { %v567_v54 = vsub.f32 %v565_v52, %v566_v53 }
 0x25b   : > { %v584_v63 = vpop.permute.xlu1 %583 }
 0x25c   : > { %v568_v55 = vmax.f32 %v567_v54, 0.0 }
 0x25d   : > { %v578_v60 = vpop.permute.xlu0 %577 }
 0x25e   : > { %v571_v56 = vadd.f32 1e-05, %v568_v55 }
 0x25f   : > { %v754_v17 = vpop.permute.xlu1 %753 }
 0x260   : > { %1122 = vrsqrt.f32 %v571_v56 }
 0x261   : > { %v717_v18 = vpop.permute.xlu0 %716 }
 0x263   : > { %v692_v19 = vpop.permute.xlu1 %691 }
 0x265   : > { %v737_v20 = vpop.permute.xlu0 %736 }
 0x26d   : > { %v1123_v59 = vpop.eup %1122 }
 0x26e   : > { %v573_v61 = vmul.f32 %v1123_v59, %v569_v57  ;;  %v574_v62 = vmul.f32 %v1123_v59, %v570_v58 }
 0x270   : > { %v580_v0 = vmul.f32 %v578_v60, %v573_v61  ;;  %v581_v2 = vmul.f32 %v578_v60, %v574_v62 }
 0x272   : > { %v586_v3 = vadd.f32 %v584_v63, %v580_v0  ;;  %v587_v4 = vadd.f32 %v584_v63, %v581_v2 }
 0x274   : > { %v588_v5 = vmax.f32 %v586_v3, 0.0  ;;  %v589_v6 = vmax.f32 %v587_v4, 0.0 }
 0x276   : > { %v592_v7 = vcombine.low %v588_v5, %v589_v6  ;;  %v1126_v8 = vcombine.low %v589_v6, %v589_v6  ;;  %v1127_v15 = vcombine.low %v588_v5, %v588_v5 }
 0x278   : > { %594 = vst [vmem:[#allocation2 + $0x4] sm:$0xff] %v592_v7  ;;  %749 = vrot.lane.b32.xlu1 %v592_v7, %s1282_s23  ;;  %712 = vrot.lane.b32.xlu0 %v592_v7, %s1285_s30  ;;  %680 = vst [vmem:[#allocation3 + $0x48] sm:$0xf] %v592_v7 }
 0x279   : > { %681 = vst [vmem:[#allocation3 + $0x28] sm:$0xf] %v1126_v8 }
 0x27c   : > { %687 = vrot.lane.b32.xlu1 %v592_v7, %s1283_s21 }
 0x27f   : > { %v652_v9 = vld [vmem:[#allocation2 + $0x8] sm:$0xf]  ;;  %v651_v10 = vld [vmem:[#allocation2] sm:$0xff] }
 0x280   : > { %660 = vrot.lane.b32.xlu0 %v652_v9, %s1286_s5  ;;  %734 = vrot.lane.b32.xlu1 %v592_v7, %s1284_s27  ;;  %v633_v11 = vld [vmem:[#allocation2 + $0x8] sm:$0xf]  ;;  %v655_v13 = vcombine.high %v651_v10, %v651_v10  ;;  %v618_v16 = vcombine.low %v651_v10, %v651_v10 }
 0x281   : > { %v596_v12 = vld [vmem:[#allocation2 + $0x8] sm:$0xf] }
 0x282   : > { %v1121_v14 = vld [vmem:[#allocation2 + $0x8] ss:$0 sps:$4 sm:$0xff]  }
 0x284   : > { %656 = vrot.lane.b32.xlu0 %v651_v10, %s1286_s5  ;;  %637 = vrot.lane.b32.xlu1 %v651_v10, %s1287_s6 }
 0x288   : > { %641 = vrot.lane.b32.xlu0 %v633_v11, %s1287_s6  ;;  %604 = vrot.lane.b32.xlu1 %v596_v12, %s1288_s10 }
 0x28c   : > { %600 = vrot.lane.b32.xlu0 %v651_v10, %s1288_s10  ;;  %622 = vrot.lane.b32.xlu1 %v651_v10, %s1289_s11 }
 0x290   : > { %602 = vrot.lane.b32.xlu0 %v655_v13, %s1288_s10  ;;  %751 = vrot.lane.b32.xlu1 %v1126_v8, %s1282_s23  ;;  %s910_s23 = scalar_lea.hbm %s1673_s4, %s1026_s14 }
 0x294   : > { %624 = vrot.lane.b32.xlu0 %v1121_v14, %s1289_s11  ;;  %689 = vrot.lane.b32.xlu1 %v1126_v8, %s1283_s21  ;;  %s898_s21 = scalar_lea.sflag [#allocation6], %s1438_s28 }
 0x298   : > { %714 = vrot.lane.b32.xlu1 %v1126_v8, %s1285_s30  ;;  %s1294_s30 = smov [#allocation10]  }
 0x299   : > { %s1212_s19 = sshll.u32 %s1294_s30, 4  ;;  %s1213_s19 = int_to_ptr.vmem [resolvable:$false] %s1212_s19 }
 0x29a   : > { %s1214_s7 = scalar_lea.vmem %s1213_s19, 256  ;;  %p1215_p4 = scmp.lt.s32.totalorder %s913_s26, %s1213_s19 }
 0x29c   : > { %658 = vrot.lane.b32.xlu1 %v655_v13, %s1286_s5 }
 0x2a0   : > { %732 = vrot.lane.b32.xlu1 %v1127_v15, %s1284_s27  ;;  %s1208_s27 = scalar_lea.vmem %s913_s26, 128 }
 0x2a1   : > { %p1209_p13 = scmp.ne.s32.totalorder %s913_s26, %s1208_s27  ;;  %p1216_p6 = scmp.lt.s32.totalorder %s1214_s7, %s1208_s27 }
 0x2a3   : > { %p1210_p1 = pnand %p1209_p13, %p1697_p0  ;;  %p1217_p8 = por %p1216_p6, %p1215_p4 }
 0x2a4   : > { %639 = vrot.lane.b32.xlu1 %v655_v13, %s1287_s6 }
 0x2a5   : > { %p1211_p2 = pneg %p1210_p1 }
 0x2a7   : > { %p1218_p12 = pnand %p1217_p8, %p1211_p2 }
 0x2a8   : > { %620 = vrot.lane.b32.xlu1 %v618_v16, %s1289_s11 }
 0x2ea   : > { %v750_v21 = vpop.permute.xlu1 %749  ;;  %v713_v22 = vpop.permute.xlu0 %712 }
 0x2ee   : > { %v688_v23 = vpop.permute.xlu1 %687 }
 0x2f2   : > { %v661_v24 = vpop.permute.xlu0 %660  ;;  %v735_v25 = vpop.permute.xlu1 %734 }
 0x2f3   : > { %v739_v28 = vsel %vm432_vm7, %v735_v25, %v737_v20 }
 0x2f4   : > { %743 = vst [vmem:[#allocation3 + $0x20] sm:$0xf0] %v739_v28 }
 0x2f6   : > { %v657_v29 = vpop.permute.xlu0 %656  ;;  %v638_v30 = vpop.permute.xlu1 %637 }
 0x2fa   : > { %v642_v31 = vpop.permute.xlu0 %641  ;;  %v605_v32 = vpop.permute.xlu1 %604 }
 0x2fe   : > { %v601_v33 = vpop.permute.xlu0 %600  ;;  %v623_v34 = vpop.permute.xlu1 %622 }
 0x302   : > { %v603_v35 = vpop.permute.xlu0 %602  ;;  %v752_v38 = vpop.permute.xlu1 %751 }
 0x303   : > { %v606_v39 = vsel %vm290_vm11, %v601_v33, %v603_v35  ;;  %v607_v40 = vsel %vm290_vm11, %v603_v35, %v605_v32  ;;  %v755_v41 = vsel %vm450_vm3, %v750_v21, %v752_v38  ;;  %v756_v42 = vsel %vm450_vm3, %v752_v38, %v754_v17  ;;  %v763_v21 = vld [vmem:[#allocation9] sm:$0xf] }
 0x304   : > { %v610_v43 = vsel %vm1502_vm5, %v606_v39, 0.0  ;;  %v611_v45 = vsel %vm1506_vm6, %v607_v40, 0.0  ;;  %v759_v46 = vsel %vm1488_vm1, %v755_v41, 0.0  ;;  %v760_v47 = vsel %vm1492_vm2, %v756_v42, 0.0 }
 0x305   : > { %612 = vst [vmem:[#allocation3 + $0x30] sm:$0xf] %v610_v43  ;;  %613 = vst [vmem:[#allocation3] sm:$0xf] %v611_v45 }
 0x306   : > { %761 = vst [vmem:[#allocation3 + $0x40] sm:$0xf] %v759_v46  ;;  %762 = vst [vmem:[#allocation3 + $0x38] sm:$0xf] %v760_v47  ;;  %v625_v48 = vpop.permute.xlu0 %624  ;;  %v690_v49 = vpop.permute.xlu1 %689 }
 0x307   : > { %v627_v50 = vsel %vm311_vm12, %v623_v34, %v625_v48  ;;  %v693_v51 = vsel %vm385_vm0, %v688_v23, %v690_v49  ;;  %v694_v52 = vsel %vm385_vm0, %v690_v49, %v692_v19  ;;  %v1293_v23 = vmov 3  }
 0x308   : > { %631 = vst [vmem:[#allocation3] sm:$0xf0] %v627_v50  ;;  %v697_v53 = vsel %vm1488_vm1, %v693_v51, 0.0  ;;  %v698_v54 = vsel %vm1492_vm2, %v694_v52, 0.0  ;;  %1110 = vset.pattern.permute.xlu1 %v1293_v23 }
 0x309   : > { %v701_v55 = vrot.slane %v697_v53, 4  ;;  %v702_v56 = vrot.slane %v698_v54, 4 }
 0x30a   : > { %v715_v57 = vpop.permute.xlu1 %714 }
 0x30b   : > { %705 = vst [vmem:[#allocation3 + $0x48] sm:$0xf0] %v701_v55  ;;  %706 = vst [vmem:[#allocation3 + $0x28] sm:$0xf0] %v702_v56  ;;  %v718_v58 = vsel %vm411_vm4, %v713_v22, %v715_v57  ;;  %v719_v59 = vsel %vm411_vm4, %v715_v57, %v717_v18  ;;  %v1292_v22 = vmov 2  }
 0x30c   : > { %v722_v60 = vsel %vm1502_vm5, %v718_v58, 0.0  ;;  %v723_v61 = vsel %vm1506_vm6, %v719_v59, 0.0  ;;  %1109 = vset.pattern.permute.xlu0 %v1292_v22 }
 0x30d   : > { %v773_v62 = vld [vmem:[#allocation3 + $0x38] sm:$0xf]  ;;  %v772_v63 = vld [vmem:[#allocation3 + $0x40] sm:$0xf]  ;;  %724 = vst [vmem:[#allocation3 + $0x8] sm:$0xf] %v722_v60 }
 0x30e   : > { %725 = vst [vmem:[#allocation3 + $0x20] sm:$0xf] %v723_v61  ;;  %1017 = vmatprep.subr.msk.mxu1 %vm474_vm9, %v773_v62  ;;  %v659_v0 = vpop.permute.xlu1 %658 }
 0x30f   : > { %1018 = vmatpush1.msk.msra.mxu1 %vm474_vm9, %v772_v63  ;;  %v662_v2 = vsel %vm353_vm8, %v657_v29, %v659_v0  ;;  %v663_v3 = vsel %vm353_vm8, %v659_v0, %v661_v24  ;;  %v765_v26 = vld [vmem:[#allocation3] sm:$0xff] }
 0x310   : > { %v666_v4 = vsel %vm1502_vm5, %v662_v2, 0.0  ;;  %v667_v5 = vsel %vm1506_vm6, %v663_v3, 0.0 }
 0x311   : > { %v670_v6 = vrot.slane %v666_v4, 4  ;;  %v671_v7 = vrot.slane %v667_v5, 4 }
 0x312   : > { %v733_v8 = vpop.permute.xlu1 %732  ;;  %v769_v17 = vld [vmem:[#allocation3 + $0x28] sm:$0xff] }
 0x313   : > { %674 = vst [vmem:[#allocation3 + $0x18] sm:$0xf0] %v670_v6  ;;  %675 = vst [vmem:[#allocation3 + $0x10] sm:$0xf0] %v671_v7  ;;  %v738_v9 = vsel %vm432_vm7, %v733_v8, %v735_v25  ;;  %v768_v18 = vld [vmem:[#allocation3 + $0x48] sm:$0xff] }
 0x314   : > { %742 = vst [vmem:[#allocation3 + $0x8] sm:$0xf0] %v738_v9 }
 0x315   : > { %v771_v10 = vld [vmem:[#allocation3 + $0x20] sm:$0xff] }
 0x316   : > { %807 = vmatprep.subr.mxu1 %v771_v10  ;;  %v640_v11 = vpop.permute.xlu1 %639 }
 0x317   : > { %v643_v12 = vsel %vm333_vm10, %v638_v30, %v640_v11  ;;  %v644_v13 = vsel %vm333_vm10, %v640_v11, %v642_v31 }
 0x318   : > { %v647_v36 = vsel %vm1488_vm1, %v643_v12, 0.0  ;;  %v648_v37 = vsel %vm1492_vm2, %v644_v13, 0.0 }
 0x319   : > { %649 = vst [vmem:[#allocation3 + $0x18] sm:$0xf] %v647_v36  ;;  %650 = vst [vmem:[#allocation3 + $0x10] sm:$0xf] %v648_v37 }
 0x31a   : > { %v621_v14 = vpop.permute.xlu1 %620 }
 0x31b   : > { %v626_v15 = vsel %vm311_vm12, %v621_v14, %v623_v34  ;;  %v770_v16 = vld [vmem:[#allocation3 + $0x8] sm:$0xff] }
 0x31c   : > { %630 = vst [vmem:[#allocation3 + $0x30] sm:$0xf0] %v626_v15  ;;  %808 = vmatpush1.msra.mxu1 %v770_v16 }
 0x31d   : > { %809 = vmatprep.subr.mxu1 %v769_v17 }
 0x31e   : > { %810 = vmatpush1.msra.mxu1 %v768_v18 }
 0x320   : > { %v767_v19 = vld [vmem:[#allocation3 + $0x10] sm:$0xff]  ;;  %v766_v20 = vld [vmem:[#allocation3 + $0x18] sm:$0xff] }
 0x321   : > { %811 = vmatprep.subr.mxu1 %v767_v19 }
 0x322   : > { %812 = vmatpush1.msra.mxu1 %v766_v20 }
 0x323   : > { %813 = vmatprep.subr.mxu1 %v765_v26  ;;  %v764_v27 = vld [vmem:[#allocation3 + $0x30] sm:$0xff] }
 0x324   : > { %814 = vmatpush1.msra.mxu1 %v764_v27 }
 0x325   : > { %1019 = vmatmul.mubr.msk.f32.vlgmr.msra.gmra.mxu1 %vm470_vm13, %v763_v21 }
 0x3e5   : > { %v849_v24 = vpop.f32.mrf.mxu1 }
 0x3e6   : > { %v860_v25 = vmul.f32 %v849_v24, %v849_v24  ;;  %v854_v31 = vsel %vm474_vm9, %v849_v24, 0.0 }
 0x3e7   : > { %v851_v28 = vpop.f32.mrf.mxu1 }
 0x3e8   : > { %v855_v29 = vsel %vm474_vm9, %v851_v28, 0.0  ;;  %v861_v30 = vmul.f32 %v851_v28, %v851_v28  ;;  %v862_v33 = vsel %vm474_vm9, %v860_v25, 0.0 }
 0x3e9   : > { %v856_v32 = vadd.f32 %v855_v29, %v854_v31 }
 0x3ea   : > { %v863_v34 = vsel %vm474_vm9, %v861_v30, 0.0 }
 0x3eb   : > { %857 = vadd.xlane.f32.xlu0 %v856_v32  ;;  %v864_v35 = vadd.f32 %v863_v34, %v862_v33 }
 0x3ed   : > { %865 = vadd.xlane.f32.xlu1 %v864_v35 }
 0x3fe   : > { %884 = vperm.xlu1 %1110, %v1554_v44  }
 0x401   : > { %878 = vperm.xlu0 %1109, %v1554_v44  }
 0x405   : > { %1111 = vset.pattern.permute.xlu0 %v1293_v23 }
 0x474   : > { %v858_v38 = vpop.xlane.xlu0 %857 }
 0x475   : > { %v859_v39 = vmul.f32 0.00390625, %v858_v38 }
 0x476   : > { %v866_v40 = vpop.xlane.xlu1 %865 }
 0x477   : > { %v867_v41 = vmul.f32 0.00390625, %v866_v40  ;;  %v868_v42 = vmul.f32 %v859_v39, %v859_v39  ;;  %v871_v47 = vsub.f32 %v849_v24, %v859_v39  ;;  %v872_v48 = vsub.f32 %v851_v28, %v859_v39 }
 0x479   : > { %v869_v43 = vsub.f32 %v867_v41, %v868_v42 }
 0x47a   : > { %v885_v44 = vpop.permute.xlu1 %884 }
 0x47b   : > { %v870_v45 = vmax.f32 %v869_v43, 0.0 }
 0x47c   : > { %v879_v50 = vpop.permute.xlu0 %878 }
 0x47d   : > { %v873_v46 = vadd.f32 1e-05, %v870_v45 }
 0x47f   : > { %1124 = vrsqrt.f32 %v873_v46 }
 0x48c   : > { %v1125_v49 = vpop.eup %1124 }
 0x48d   : > { %v875_v51 = vmul.f32 %v1125_v49, %v871_v47  ;;  %v876_v52 = vmul.f32 %v1125_v49, %v872_v48 }
 0x48f   : > { %v881_v53 = vmul.f32 %v879_v50, %v875_v51  ;;  %v882_v54 = vmul.f32 %v879_v50, %v876_v52 }
 0x491   : > { %v887_v55 = vadd.f32 %v885_v44, %v881_v53  ;;  %v888_v56 = vadd.f32 %v885_v44, %v882_v54 }
 0x493   : > { %v892_v57 = vcombine.low %v887_v55, %v888_v56 }
 0x495   : > { %v894_v58 = vadd.f32 %v892_v57, %v1452_v1 }
 0x497   : > { %v895_v59 = vmax.f32 %v894_v58, 0.0 }
 0x499   : > { %896 = vst [vmem:[%s238_s25] sm:$0xff] %v895_v59 }
 0x49a   : > { %1221 = shalt.err (!%p1218_p12)
}
 0x49b   : > { %s1222_s5 = scalar_lea.hbm %s910_s23, 128  ;;  %s1226_s10 = scalar_lea.hbm %s1673_s4, 256 }
 0x49c   : > { %p1223_p3 = scmp.ne.s32.totalorder %s910_s23, %s1222_s5  ;;  %p1227_p5 = scmp.lt.s32.totalorder %s910_s23, %s1673_s4 }
 0x49d   : > { %p1228_p9 = scmp.lt.s32.totalorder %s1226_s10, %s1222_s5 }
 0x49e   : > { %p1224_p7 = pnand %p1223_p3, %p1697_p0 }
 0x49f   : > { %p1229_p11 = por %p1228_p9, %p1227_p5 }
 0x4a0   : > { %p1225_p10 = pneg %p1224_p7 }
 0x4a2   : > { %p1230_p13 = pnand %p1229_p11, %p1225_p10 }
 0x4a4   : > { %1233 = shalt.err (!%p1230_p13)
}
 0x4a5   : > { %1037 = dma.vmem_to_hbm [thread:$0]  (%p1697_p0), %s913_s26, 128, %s910_s23, %s898_s21  }
 0x4a6 PF: > { %s924_s24 = sand.u32 1, %s1264_s15   ;;  %p1698_p1 = scmp.ne.s32.totalorder %s1679_s22, 0 }
 0x4a7   : > { %p1699_p2 = scmp.ge.s32.totalorder %s1276_s18, 2  ;;  %s925_s14 = scalar_lea.sflag [#allocation6], %s924_s24 }
 0x4a9   : > { %p1051_p4 = pnand %p1699_p2, %p1698_p1 }
 0x4ab   : > { %p1052_p6 = pneg %p1051_p4 }
 0x4ad   : > { %1259 = dma.done.wait (%p1052_p6), %s925_s14, 128  }
 0x4ae   : > { %1261 = vsyncadd (%p1052_p6), %s925_s14, 4294967168  ;;  %p18_p8 = scmp.ge.s32.totalorder %s1374_s29, 4   ;;  %s1700_s15 = smov %s1268_s16 }
 0x4af   : > { %s1701_s16 = smov %s1272_s17  ;;  %s1702_s17 = smov %s1401_s12 }
 0x4b0   : > { %s1703_s18 = smov %s1374_s29  ;;  %20 = sbr.rel (!%p18_p8) target bundleno = 6 (0x6), region = 89 }
 0x4b5   :  { %930 = vsyncpa [#allocation5], 1 }
 0x4b6   :  { %932 = vsyncpa [#allocation5 + $0x1], 1 }
 0x4b7   :  { %933 = vsyncpa [#allocation8], 1 }
 0x4b8   :  { %934 = vsyncpa [#allocation6], 1 }
 0x4b9   :  { %936 = vsyncpa [#allocation6 + $0x1], 1 }

</bundles_post_ra>
